<compile_context>
chip_gen: v7x
topology: tpu7x:2x2x1
jax: 0.10.0
libtpu: 0.0.40
codegen_flags: <defaults>
</compile_context>

<pallas_src>
import functools

import jax
import jax.numpy as jnp
from jax.experimental import pallas as pl
from jax.experimental.pallas import tpu as pltpu


def _round_up(x, m):
    return ((x + m - 1) // m) * m


def _cdiv(a, b):
    return (a + b - 1) // b


# ---------------------------------------------------------------------------
# Kernels
# ---------------------------------------------------------------------------
def _logits_kernel(idx_ref, emb_ref, logits_ref):
    """Embedding lookup for one row tile: one-hot(idx) @ table (MXU)."""
    idx = idx_ref[...]                                      # (TN, 1) int32
    tn = idx.shape[0]
    v = emb_ref.shape[1]
    col = jax.lax.broadcasted_iota(jnp.int32, (tn, v), 1)   # (TN, V)
    onehot = (col == idx).astype(jnp.float32)               # (TN, V)
    logits_ref[...] = jnp.dot(onehot, emb_ref[...],
                              preferred_element_type=jnp.float32,
                              precision=jax.lax.Precision.HIGHEST)


def _logits_loss_kernel(idx_ref, tgt_ref, emb_ref, logits_ref, nll_ref, *,
                        n_rows):
    """Embedding lookup + per-tile partial NLL sum for one row tile.

    Rows whose global index is >= n_rows (ragged final block padding) are
    masked to 0 before the in-tile reduction; the wrapper finishes the mean
    (sum / n_rows), so no cross-tile accumulator is needed and the grid axis
    stays 'parallel'.
    """
    i = pl.program_id(0)
    idx = idx_ref[...]                                      # (TN, 1) int32
    tgt = tgt_ref[...]                                      # (TN, 1) int32
    tn = idx.shape[0]
    v = emb_ref.shape[1]
    col = jax.lax.broadcasted_iota(jnp.int32, (tn, v), 1)   # (TN, V)

    onehot = (col == idx).astype(jnp.float32)
    logits = jnp.dot(onehot, emb_ref[...],
                     preferred_element_type=jnp.float32,
                     precision=jax.lax.Precision.HIGHEST)   # (TN, V)
    logits_ref[...] = logits

    # cross entropy = logsumexp(logits) - logits[target]
    # The max-shift m cancels in the difference, so `shifted` is reused and
    # one (TN, V) elementwise pass is saved.
    m = jnp.max(logits, axis=-1, keepdims=True)             # (TN, 1)
    shifted = logits - m
    lse_shifted = jnp.log(jnp.sum(jnp.exp(shifted), axis=-1, keepdims=True))
    tgt_onehot = (col == tgt).astype(jnp.float32)
    picked_shifted = jnp.sum(tgt_onehot * shifted, axis=-1, keepdims=True)

    # Mask by global row index (handles the ragged final block).
    row = jax.lax.broadcasted_iota(jnp.int32, (tn, 1), 0)   # (TN, 1)
    valid = ((i * tn + row) < n_rows).astype(jnp.float32)
    nll = (lse_shifted - picked_shifted) * valid            # (TN, 1)

    # Per-tile partial sum, emitted as one dense (8, 128) tile: value at
    # [0, 0], zeros elsewhere (wrapper just sums everything).
    tile_sum = jnp.sum(nll)
    r8 = jax.lax.broadcasted_iota(jnp.int32, (8, 128), 0)
    c128 = jax.lax.broadcasted_iota(jnp.int32, (8, 128), 1)
    nll_ref[...] = jnp.where((r8 == 0) & (c128 == 0), tile_sum, 0.0)


# ---------------------------------------------------------------------------
# Wrapper
# ---------------------------------------------------------------------------
def bigram_forward(embedding_table, idx, targets=None, tile_rows=2048):
    """Mirrors BigramLanguageModel.forward.

    embedding_table: (V, V) float32
    idx:             (B, T) int32
    targets:         optional (B, T) int32
    Returns logits (B, T, V) if targets is None, else (logits (B*T, V), loss ()).
    """
    B, T = idx.shape
    V = embedding_table.shape[0]
    N = B * T

    # Row tile: multiple of 8, large (amortize per-grid-step overhead), capped
    # at 4096 to fit comfortably in v7x's VMEM budget, and capped at
    # round_up(ceil(N/2), 8) so there are >= 2 grid steps whenever N > 8
    # (v7x megacore needs >= 2 tiles to engage both TensorCores).
    tn = _round_up(min(int(tile_rows), 4096), 8)
    if N > 8:
        tn = min(tn, _round_up(_cdiv(N, 2), 8))
    tn = max(tn, 8)
    num_tiles = _cdiv(N, tn)

    idx_flat = idx.reshape(N, 1).astype(jnp.int32)

    row_spec = pl.BlockSpec((tn, 1), lambda i: (i, 0))       # idx / targets
    logits_spec = pl.BlockSpec((tn, V), lambda i: (i, 0))    # ragged last block OK
    table_spec = pl.BlockSpec((V, V), lambda i: (0, 0))      # VMEM-resident

    compiler_params = pltpu.CompilerParams(
        dimension_semantics=("parallel",),                   # megacore on v7x
        vmem_limit_bytes=48 * 1024 * 1024,                   # headroom on v7x (64 MiB phys)
    )

    if targets is None:
        cost = pl.CostEstimate(
            flops=2 * N * V * V,
            transcendentals=0,
            bytes_accessed=N * V * 4 + N * 4 + V * V * 4,
        )
        logits = pl.pallas_call(
            _logits_kernel,
            out_shape=jax.ShapeDtypeStruct((N, V), jnp.float32),
            grid=(num_tiles,),
            in_specs=[row_spec, table_spec],
            out_specs=logits_spec,
            compiler_params=compiler_params,
            cost_estimate=cost,
        )(idx_flat, embedding_table)
        return logits.reshape(B, T, V)

    tgt_flat = targets.reshape(N, 1).astype(jnp.int32)
    kernel = functools.partial(_logits_loss_kernel, n_rows=N)
    nll_spec = pl.BlockSpec((8, 128), lambda i: (i, 0))      # dense per-tile sum

    cost = pl.CostEstimate(
        flops=2 * N * V * V + 8 * N * V,
        transcendentals=N * V + N,
        bytes_accessed=(N * V * 4 + 2 * N * 4 + V * V * 4
                        + num_tiles * 8 * 128 * 4),
    )
    logits, nll_tiles = pl.pallas_call(
        kernel,
        out_shape=(jax.ShapeDtypeStruct((N, V), jnp.float32),
                   jax.ShapeDtypeStruct((num_tiles * 8, 128), jnp.float32)),
        grid=(num_tiles,),
        in_specs=[row_spec, row_spec, table_spec],
        out_specs=(logits_spec, nll_spec),
        compiler_params=compiler_params,
        cost_estimate=cost,
    )(idx_flat, tgt_flat, embedding_table)

    # Only element [0, 0] of each (8, 128) tile is non-zero; everything else
    # is exactly 0, so a flat sum over num_tiles*1024 elements is exact.
    loss = jnp.sum(nll_tiles) / jnp.float32(N)
    return logits, loss


# ---------------------------------------------------------------------------
# Reference (plain JAX) for validation
# ---------------------------------------------------------------------------
def _reference_forward(embedding_table, idx, targets=None):
    logits = embedding_table[idx]                 # (B, T, V)
    if targets is None:
        return logits
    B, T, V = logits.shape
    lg = logits.reshape(B * T, V)
    tg = targets.reshape(B * T)
    lse = jax.scipy.special.logsumexp(lg, axis=-1)
    picked = jnp.take_along_axis(lg, tg[:, None], axis=-1)[:, 0]
    loss = jnp.mean(lse - picked)
    return lg, loss


# ---------------------------------------------------------------------------
if __name__ == "__main__":
    key = jax.random.PRNGKey(0)
    k_emb, k_idx, k_tgt, k_idx2, k_tgt2, k_idx3, k_tgt3 = jax.random.split(key, 7)

    vocab_size = 65          # e.g. tiny-shakespeare char vocab
    B, T = 2, 8

    # nn.Embedding default init ~ N(0, 1); deterministic here.
    embedding_table = jax.random.normal(k_emb, (vocab_size, vocab_size),
                                        dtype=jnp.float32)
    idx = jax.random.randint(k_idx, (B, T), 0, vocab_size, dtype=jnp.int32)
    targets = jax.random.randint(k_tgt, (B, T), 0, vocab_size, dtype=jnp.int32)

    # Path 1: targets=None -> logits (B, T, V)
    logits_only = jax.block_until_ready(bigram_forward(embedding_table, idx))
    ref_logits = _reference_forward(embedding_table, idx)
    assert logits_only.shape == (B, T, vocab_size)
    assert jnp.allclose(logits_only, ref_logits, atol=1e-5, rtol=1e-5)

    # Path 2: with targets -> (logits (B*T, V), loss scalar), 2 tiles of 8 rows
    logits, loss = bigram_forward(embedding_table, idx, targets)
    logits = jax.block_until_ready(logits)
    loss = jax.block_until_ready(loss)
    ref_lg, ref_loss = _reference_forward(embedding_table, idx, targets)
    assert logits.shape == (B * T, vocab_size)
    assert jnp.allclose(logits, ref_lg, atol=1e-5, rtol=1e-5)
    assert jnp.allclose(loss, ref_loss, atol=1e-5, rtol=1e-5)

    # Path 3: multi-tile + ragged final block (N=400, tile_rows=128 -> 4 tiles,
    # last tile has only 16 valid rows).
    B2, T2 = 4, 100
    idx2 = jax.random.randint(k_idx2, (B2, T2), 0, vocab_size, dtype=jnp.int32)
    tgt2 = jax.random.randint(k_tgt2, (B2, T2), 0, vocab_size, dtype=jnp.int32)
    logits2, loss2 = bigram_forward(embedding_table, idx2, tgt2, tile_rows=128)
    logits2 = jax.block_until_ready(logits2)
    loss2 = jax.block_until_ready(loss2)
    ref_lg2, ref_loss2 = _reference_forward(embedding_table, idx2, tgt2)
    assert logits2.shape == (B2 * T2, vocab_size)
    assert jnp.allclose(logits2, ref_lg2, atol=1e-5, rtol=1e-5)
    assert jnp.allclose(loss2, ref_loss2, atol=1e-5, rtol=1e-5)

    # Path 4: default tiling with ragged final block (N=21 -> tn=16, 2 tiles,
    # last tile has 5 valid rows).
    B3, T3 = 3, 7
    idx3 = jax.random.randint(k_idx3, (B3, T3), 0, vocab_size, dtype=jnp.int32)
    tgt3 = jax.random.randint(k_tgt3, (B3, T3), 0, vocab_size, dtype=jnp.int32)
    logits3, loss3 = bigram_forward(embedding_table, idx3, tgt3)
    logits3 = jax.block_until_ready(logits3)
    loss3 = jax.block_until_ready(loss3)
    ref_lg3, ref_loss3 = _reference_forward(embedding_table, idx3, tgt3)
    assert logits3.shape == (B3 * T3, vocab_size)
    assert jnp.allclose(logits3, ref_lg3, atol=1e-5, rtol=1e-5)
    assert jnp.allclose(loss3, ref_loss3, atol=1e-5, rtol=1e-5)

    # TODO(synk): `generate` uses torch.multinomial sampling in a Python loop;
    # it is an autoregressive sampling driver, not a kernel hot path, so it is
    # not ported here.
    print("KERNEL_OK")
</pallas_src>

<mosaic_0001>
module attributes {stable_mosaic.version = 11 : i64} {
  func.func @_logits_kernel(%arg0: i32, %arg1: memref<8x1xi32, #tpu.memory_space<vmem>>, %arg2: memref<65x65xf32, #tpu.memory_space<vmem>>, %arg3: memref<8x65xf32, #tpu.memory_space<vmem>>) attributes {dimension_semantics = [#tpu.dimension_semantics<parallel>], iteration_bounds = array<i64: 2>, scalar_prefetch = 0 : i64, scratch_operands = 0 : i64, tpu.core_type = #tpu.core_type<tc>, window_params = [{transform_indices = @transform_0, window_bounds = array<i64: 8, 1>}, {pipeline_mode = #tpu.pipeline_mode<synchronous>, transform_indices = @transform_1, window_bounds = array<i64: 65, 65>}, {transform_indices = @transform_2, window_bounds = array<i64: 8, 65>}]} {
    %c0 = arith.constant 0 : index
    %c0_0 = arith.constant 0 : index
    %0 = vector.load %arg1[%c0, %c0_0] : memref<8x1xi32, #tpu.memory_space<vmem>>, vector<8x1xi32>
    %1 = tpu.iota {dimensions = array<i32: 1>} : vector<8x65xi32>
    %2 = vector.broadcast %0 : vector<8x1xi32> to vector<8x65xi32>
    %3 = arith.cmpi eq, %1, %2 : vector<8x65xi32>
    %4 = arith.extui %3 : vector<8x65xi1> to vector<8x65xi32>
    %5 = arith.sitofp %4 : vector<8x65xi32> to vector<8x65xf32>
    %c0_1 = arith.constant 0 : index
    %c0_2 = arith.constant 0 : index
    %6 = vector.load %arg2[%c0_1, %c0_2] : memref<65x65xf32, #tpu.memory_space<vmem>>, vector<65x65xf32>
    %cst = arith.constant dense<0.000000e+00> : vector<8x65xf32>
    %7 = tpu.matmul %5, %6, %cst {dimension_numbers = #tpu.dot_dimension_numbers<[1], [0], [0], [1], [0, 0, 1, 1], [], []>, precision = #tpu.contract_precision<fp32>} : vector<8x65xf32>, vector<65x65xf32>, vector<8x65xf32> -> vector<8x65xf32>
    %c0_3 = arith.constant 0 : index
    %c0_4 = arith.constant 0 : index
    %8 = vector.load %arg3[%c0_3, %c0_4] : memref<8x65xf32, #tpu.memory_space<vmem>>, vector<8x65xf32>
    tpu.vector_store %arg3[%c0_3, %c0_4], %7 {strides = array<i32>} : memref<8x65xf32, #tpu.memory_space<vmem>>, vector<8x65xf32>,
    return
  }
  func.func @transform_0(%arg0: i32) -> (i32, i32) {
    %c0_i32 = arith.constant 0 : i32
    %c0_i32_0 = arith.constant 0 : i32
    return %arg0, %c0_i32 : i32, i32
  }
  func.func @transform_1(%arg0: i32) -> (i32, i32) {
    %c0_i32 = arith.constant 0 : i32
    %c0_i32_0 = arith.constant 0 : i32
    %c0_i32_1 = arith.constant 0 : i32
    return %c0_i32, %c0_i32_0 : i32, i32
  }
  func.func @transform_2(%arg0: i32) -> (i32, i32) {
    %c0_i32 = arith.constant 0 : i32
    %c0_i32_0 = arith.constant 0 : i32
    return %arg0, %c0_i32 : i32, i32
  }
}

</mosaic_0001>

<bundles_post_ra>
// kernel: tpu_custom_call.1
= control target key start
LH: loop header
LB: loop body
LE: loop exit
PB: predicated region body
PF: predicated region fallthrough
CT: control target
= control target key end

     0   :  { %7 = vsyncpa [#allocation3], 0  ;;  %s1527_s0 = inlined_call_operand.vmem [shape: s32[16,1], index: 0, kind: input, shape index: {}]   ;;  %s1528_s1 = inlined_call_operand.hbm [shape: f32[65,65], index: 1, kind: input, shape index: {}]   ;;  %s1529_s2 = inlined_call_operand.hbm [shape: f32[16,65], index: 2, kind: output, shape index: {}]  }
   0x1   :  { %8 = vsyncpa [#allocation4], 0 }
   0x2   :  { %10 = vsyncpa [#allocation4 + $0x1], 0  ;;  %s1275_s9 = smov 0   ;;  %s1277_s10 = smov 0  }
   0x3   :  { %s1279_s11 = smov 0   ;;  %s1281_s12 = smov 0  }
   0x4 LB: > { %s1296_s13 = sadd.s32 4294967295, %s1250_s12   ;;  %s816_s14 = sadd.s32 4294967294, %s1250_s12   ;;  %s1250_s12 = sphi %s1281_s12, %s1545_s12   ;;  %s1246_s11 = sphi %s1279_s11, %s1544_s11   ;;  %s1242_s10 = sphi %s1277_s10, %s1543_s10   ;;  %s1238_s9 = sphi %s1275_s9, %s1542_s9  }
   0x5   : > { %s1300_s15 = sadd.s32 1, %s1250_s12   ;;  %s70_s16 = sadd.s32 1, %s1246_s11 }
   0x6   : > { %s67_s17 = ssub.s32 %s1250_s12, %s1300_s15  ;;  %p80_p0 = scmp.ne.s32.totalorder %s1246_s11, %s1242_s10 }
   0x7   : > { %p68_p1 = scmp.eq.s32.totalorder %s67_s17, 0  ;;  %p81_p2 = scmp.eq.s32.totalorder %s1296_s13, 1 }
   0x8   : > { %p86_p3 = scmp.ne.s32.totalorder %s1242_s10, %s1238_s9  ;;  %p87_p4 = scmp.eq.s32.totalorder %s816_s14, 1 }
   0x9   : > { %s1311_s18 = scalar_select %p68_p1, %s1246_s11, %s70_s16  }
   0xa   : > { %p1313_p5 = por %p81_p2, %p80_p0  ;;  %p1317_p6 = por %p87_p4, %p86_p3 }
   0xb   : > { %p817_p7 = scmp.ge.s32.totalorder %s1250_s12, 1  ;;  %p94_p8 = scmp.lt.s32.totalorder %s1250_s12, 3 }
   0xc   : > { %s1533_s19 = scalar_select %p1313_p5, 1, 0 }
   0xd   : > { %s1534_s20 = scalar_select %p1317_p6, 1, 0 }
   0xe   : > { %p1530_p9 = scmp.eq.s32.totalorder %s1296_s13, 0  ;;  %p1324_p10 = pnand %p817_p7, %p94_p8 }
   0xf   : > { %s1252_s22 = smov [#allocation2]   ;;  %s1156_s27 = scalar_lea.hbm %s1528_s1, 1152 }
  0x10   : > { %s1535_s21 = scalar_select %p1324_p10, 1, 0 }
  0x11   : > { %s106_s23 = sshll.u32 %s1252_s22, 4  ;;  %p1105_p11 = pneg %p1324_p10  ;;  %s107_s23 = int_to_ptr.vmem [resolvable:$true] %s106_s23 }
  0x12   : > { %p1157_p13 = scmp.ne.s32.totalorder %s1528_s1, %s1156_s27  ;;  %p1163_p3 = scmp.lt.u32.totalorder %s1156_s27, %s1528_s1 }
  0x13   : > { %p1332_p12 = pnand %p1530_p9, %p1105_p11 }
  0x15   : > { %p1158_p0 = pneg %p1332_p12 }
  0x17   : > { %p1159_p1 = pnand %p1158_p0, %p1157_p13 }
  0x19   : > { %p1160_p2 = pneg %p1159_p1 }
  0x1b   : > { %p1165_p4 = pnand %p1163_p3, %p1160_p2 }
  0x1d   : > { %1168 = shalt.err (!%p1165_p4)
}
  0x1e   : > { %s1169_s4 = scalar_lea.vmem %s107_s23, 1152  ;;  %p1177_p9 = scmp.lt.s32.totalorder %s107_s23, %s107_s23 }
  0x1f   : > { %p1170_p7 = scmp.ne.s32.totalorder %s107_s23, %s1169_s4  ;;  %p1178_p6 = scmp.lt.s32.totalorder %s1169_s4, %s1169_s4 }
  0x21   : > { %p1172_p8 = pnand %p1170_p7, %p1158_p0  ;;  %p1179_p5 = por %p1178_p6, %p1177_p9 }
  0x23   : > { %p1173_p11 = pneg %p1172_p8 }
  0x25   : > { %p1180_p10 = pnand %p1179_p5, %p1173_p11 }
  0x27   : > { %1183 = shalt.err (!%p1180_p10)
}
  0x28   : > { %s1253_s5 = smov 128   ;;  %s1254_s6 = smov 8  }
  0x29   : > { %1108 = dma.hbm_to_vmem [thread:$0]  (!%p1332_p12), %s1528_s1, 1152, %s107_s23, [#allocation3], %s1253_s5, %s1253_s5, %s1254_s6  }
  0x2a   : > { %p1537_p13 = scmp.ne.s32.totalorder %s1535_s21, 0 }
  0x2b   : > { %p1538_p1 = scmp.eq.s32.totalorder (!%p1537_p13), %s1296_s13, 0 }
  0x2c   : > { %129 = sbr.rel (%p1537_p13) target bundleno = 462 (0x1ce), region = 28 }
  0x33   : > { %1229 = dma.done.wait (%p1538_p1), [#allocation3], 1152   ;;  %p1539_p0 = pmov %p1538_p1 }
  0x34   : > { %p150_p5 = scmp.lt.s32.totalorder %s1296_s13, 1  ;;  %v1255_v0 = vmov 0   ;;  %v1256_v1 = vmov 0.0|0.0   ;;  %v163_v3 = vld [vmem:[#allocation2] sm:$0xff]  ;;  %v164_v4 = vld [vmem:[#allocation2 + $0x8] sm:$0xff]  ;;  %v165_v7 = vld [vmem:[#allocation2 + $0x10] sm:$0xff] }
  0x35   : > { %1231 = vsyncadd (%p1539_p0), [#allocation3], 4294966144  ;;  %1155 = vset.pattern.permute.xlu0 %v1255_v0  ;;  %1054 = vmatprep.subr.bf16.mxu0 %v1256_v1  ;;  %v181_v5 = vand.u32 4294901760, %v163_v3  ;;  %v184_v6 = vand.u32 4294901760, %v164_v4  ;;  %v166_v8 = vld [vmem:[#allocation2 + $0x18] sm:$0xff]  ;;  %v167_v9 = vld [vmem:[#allocation2 + $0x20] sm:$0xff] }
  0x36   : > { %s151_s14 = scalar_select %p150_p5, %s1296_s13, 1  ;;  %1018 = vmatprep.subr.bf16.mxu1 %v1256_v1  ;;  %v187_v10 = vand.u32 4294901760, %v165_v7  ;;  %v190_v11 = vand.u32 4294901760, %v166_v8  ;;  %v168_v12 = vld [vmem:[#allocation2 + $0x28] sm:$0xff]  ;;  %v193_v13 = vand.u32 4294901760, %v167_v9  ;;  %v169_v14 = vld [vmem:[#allocation2 + $0x30] sm:$0xff] }
  0x37   : > { %v170_v15 = vld [vmem:[#allocation2 + $0x38] sm:$0xff]  ;;  %v1365_v16 = vpack.c.bf16 %v184_v6, %v181_v5  ;;  %v1367_v17 = vsub.f32 %v163_v3, %v181_v5  ;;  %v1369_v18 = vsub.f32 %v164_v4, %v184_v6  ;;  %v196_v19 = vand.u32 4294901760, %v168_v12  ;;  %v171_v36 = vld [vmem:[#allocation2 + $0x40] sm:$0x1]  ;;  %s147_s23 = sand.u32 1, %s1242_s10   ;;  %s829_s25 = sshll.u32 %s1296_s13, 7 }
  0x38   : > { %s823_s16 = sshll.u32 %s151_s14, 3  ;;  %v1371_v20 = vsub.f32 %v165_v7, %v187_v10  ;;  %v1373_v21 = vsub.f32 %v166_v8, %v190_v11  ;;  %v1375_v22 = vsub.f32 %v167_v9, %v193_v13  ;;  %v1379_v23 = vpack.c.bf16 %v190_v11, %v187_v10  ;;  %s822_s24 = sshll.u32 %s147_s23, 3 }
  0x39   : > { %s153_s22 = scalar_lea.vmem %s1527_s0, %s823_s16  ;;  %1056 = vmatpush3.bf16.msra.mxu0 %v1365_v16  ;;  %1020 = vmatpush3.bf16.msra.mxu1 %v1365_v16  ;;  %v1381_v24 = vsub.f32 %v168_v12, %v196_v19  ;;  %v199_v25 = vand.u32 4294901760, %v169_v14  ;;  %v202_v26 = vand.u32 4294901760, %v170_v15  ;;  %v267_v27 = vand.u32 4294901760, %v1367_v17  ;;  %s149_s26 = scalar_lea.vmem [#allocation5], %s822_s24 }
  0x3a   : > { %v154_v2 = vld [vmem:[%s153_s22] sm:$0xff]  ;;  %1057 = vmatprep.subr.bf16.mxu0 %v1256_v1  ;;  %1021 = vmatprep.subr.bf16.mxu1 %v1256_v1  ;;  %v274_v28 = vand.u32 4294901760, %v1369_v18  ;;  %vm1257_vm0 = vmmov 0   ;;  %v1258_v31 = vmov 0.0   ;;  %v1401_v35 = vpack.c.bf16 %v196_v19, %v193_v13  ;;  %s745_s27 = sshll.u32 %s149_s26, 4  ;;  %s1484_s30 = scalar_lea.hbm %s1529_s2, %s829_s25  ;;  %s1486_s27 = int_to_ptr.vmem [resolvable:$true] %s745_s27 }
  0x3b   : > { %158 = vperm.xlu0 %1155, %v154_v2   ;;  %v1387_v29 = vsub.f32 %v169_v14, %v199_v25  ;;  %v1389_v30 = vsub.f32 %v170_v15, %v202_v26  ;;  %973 = vmatprep.mubr.msk.f32.mxu0 %vm1257_vm0, %v1258_v31  ;;  %v268_v33 = vsub.f32 %v1367_v17, %v267_v27  ;;  %vm176_vm1 = vcmask 1040384   ;;  %s732_s3 = scalar_lea.sflag [#allocation4], %s147_s23  ;;  %s1184_s4 = scalar_lea.vmem %s1486_s27, 128 }
  0x3c   : > { %910 = vmatprep.mubr.msk.f32.mxu1 %vm1257_vm0, %v1258_v31  ;;  %v1395_v32 = vpack.c.bf16 %v274_v28, %v267_v27  ;;  %v275_v34 = vsub.f32 %v1369_v18, %v274_v28  ;;  %v281_v37 = vand.u32 4294901760, %v1371_v20  ;;  %v288_v38 = vand.u32 4294901760, %v1373_v21  ;;  %p1185_p6 = scmp.ne.s32.totalorder %s1486_s27, %s1184_s4  ;;  %p1540_p9 = scmp.ne.s32.totalorder %s1533_s19, 0 }
  0x3d   : > { %1059 = vmatpush3.bf16.msra.mxu0 %v1379_v23  ;;  %1023 = vmatpush3.bf16.msra.mxu1 %v1379_v23  ;;  %v269_v39 = vand.u32 4294901760, %v268_v33  ;;  %v1409_v44 = vpack.c.bf16 %v202_v26, %v199_v25  ;;  %v178_v45 = vsel %vm176_vm1, %v171_v36, 0  ;;  %v295_v49 = vand.u32 4294901760, %v1375_v22  ;;  %s1259_s13 = smov [#allocation5]  }
  0x3e   : > { %1060 = vmatprep.subr.bf16.mxu0 %v1256_v1  ;;  %1024 = vmatprep.subr.bf16.mxu1 %v1256_v1  ;;  %v276_v40 = vand.u32 4294901760, %v275_v34  ;;  %v1070_v41 = vpack.c.bf16 %v288_v38, %v281_v37  ;;  %v282_v42 = vsub.f32 %v1371_v20, %v281_v37  ;;  %v289_v43 = vsub.f32 %v1373_v21, %v288_v38  ;;  %p1186_p10 = pnand %p1185_p6, %p1540_p9  ;;  %s1188_s5 = sshll.u32 %s1259_s13, 4  ;;  %s1189_s5 = int_to_ptr.vmem [resolvable:$false] %s1188_s5 }
  0x3f   : > { %v302_v50 = vand.u32 4294901760, %v1381_v24  ;;  %v296_v53 = vsub.f32 %v1375_v22, %v295_v49  ;;  %v1419_v55 = vand.u32 4294901760, %v178_v45  ;;  %v309_v58 = vand.u32 4294901760, %v1387_v29  ;;  %s1190_s6 = scalar_lea.vmem %s1189_s5, 256  ;;  %p1191_p2 = scmp.lt.s32.totalorder %s1486_s27, %s1189_s5 }
  0x40   : > { %v1031_v46 = vpack.c.bf16 %v276_v40, %v269_v39  ;;  %v283_v47 = vand.u32 4294901760, %v282_v42  ;;  %v290_v48 = vand.u32 4294901760, %v289_v43  ;;  %v316_v59 = vand.u32 4294901760, %v1389_v30  ;;  %p1187_p12 = pneg %p1186_p10  ;;  %p1192_p3 = scmp.lt.s32.totalorder %s1190_s6, %s1184_s4 }
  0x41   : > { %1062 = vmatpush3.bf16.msra.mxu0 %v1401_v35  ;;  %1026 = vmatpush3.bf16.msra.mxu1 %v1401_v35  ;;  %v1073_v52 = vpack.c.bf16 %v302_v50, %v295_v49  ;;  %v303_v54 = vsub.f32 %v1381_v24, %v302_v50  ;;  %v297_v56 = vand.u32 4294901760, %v296_v53  ;;  %v310_v62 = vsub.f32 %v1387_v29, %v309_v58 }
  0x42   : > { %1063 = vmatprep.subr.bf16.mxu0 %v1256_v1  ;;  %1027 = vmatprep.subr.bf16.mxu1 %v1256_v1  ;;  %v1034_v51 = vpack.c.bf16 %v290_v48, %v283_v47  ;;  %v1076_v61 = vpack.c.bf16 %v316_v59, %v309_v58  ;;  %v317_v63 = vsub.f32 %v1389_v30, %v316_v59  ;;  %v155_v8 = vlaneseq  ;;  %p1193_p4 = por %p1192_p3, %p1191_p2 }
  0x43   : > { %v304_v57 = vand.u32 4294901760, %v303_v54  ;;  %v311_v0 = vand.u32 4294901760, %v310_v62  ;;  %v1043_v4 = vpack.c.bf16 %v1369_v18, %v1367_v17  ;;  %v1046_v5 = vpack.c.bf16 %v1373_v21, %v1371_v20 }
  0x44   : > { %v318_v2 = vand.u32 4294901760, %v317_v63  ;;  %v1049_v6 = vpack.c.bf16 %v1381_v24, %v1375_v22  ;;  %v1052_v7 = vpack.c.bf16 %v1389_v30, %v1387_v29  ;;  %v156_v9 = vand.u32 127, %v155_v8  ;;  %p1194_p7 = pnand %p1193_p4, %p1187_p12 }
  0x45   : > { %1065 = vmatpush3.bf16.msra.mxu0 %v1409_v44  ;;  %1029 = vmatpush3.bf16.msra.mxu1 %v1409_v44  ;;  %v1037_v60 = vpack.c.bf16 %v304_v57, %v297_v56  ;;  %vm172_vm2 = vcmask 531456   ;;  %v322_v18 = vsub.f32 %v178_v45, %v1419_v55 }
  0x46   : > { %971 = vmatprep.subr.mxu0 %v1258_v31  ;;  %908 = vmatprep.subr.mxu1 %v1258_v31  ;;  %v1040_v3 = vpack.c.bf16 %v318_v2, %v311_v0 }
  0x47   : > { %v323_v19 = vand.u32 4294901760, %v322_v18 }
  0x49   : > { %972 = vmatpush3.msra.mxu0 %v1419_v55  ;;  %909 = vmatpush3.msra.mxu1 %v1419_v55  ;;  %v324_v20 = vsub.f32 %v322_v18, %v323_v19 }
  0x4a   : > { %1066 = vmatprep.subr.bf16.mxu0 %v1256_v1  ;;  %1030 = vmatprep.subr.bf16.mxu1 %v1256_v1 }
  0x4b   : > { %v325_v21 = vand.u32 4294901760, %v324_v20 }
  0xba   : > { %v159_v10 = vpop.permute.xlu0 %158 }
  0xbb   : > { %vm160_vm3 = vcmp.eq.s32.totalorder %v156_v9, %v159_v10 }
  0xbc   : > { %v824_v11 = vsel %vm160_vm3, 1.0, %v1258_v31 }
  0xbd   : > { %v174_v12 = vsel %vm172_vm2, %v824_v11, 0 }
  0xbe   : > { %v255_v13 = vsub.f32 %v174_v12, %v174_v12 }
  0xc0   : > { %v256_v14 = vand.u32 4294901760, %v255_v13 }
  0xc2   : > { %974 = vmatmul.mubr.f32.vlgmr.msra.gmra.mrb[0].mxu0 %v256_v14  ;;  %v257_v15 = vsub.f32 %v255_v13, %v256_v14 }
  0xc3   : > { %1068 = vmatpush3.bf16.msra.mxu0 %v1395_v32  ;;  %994 = vmatprep.mubr.msk.f32.mxu0 %vm1257_vm0, %v1258_v31 }
  0xc4   : > { %1069 = vmatprep.subr.bf16.mxu0 %v1256_v1  ;;  %v258_v17 = vand.u32 4294901760, %v257_v15 }
  0xc6   : > { %911 = vmatmul.mubr.f32.vlgmr.msra.gmra.mrb[0].mxu1 %v258_v17 }
  0xc7   : > { %1032 = vmatpush3.bf16.msra.mxu1 %v1031_v46  ;;  %1071 = vmatpush3.bf16.msra.mxu0 %v1070_v41 }
  0xc8   : > { %1033 = vmatprep.subr.bf16.mxu1 %v1256_v1  ;;  %1072 = vmatprep.subr.bf16.mxu0 %v1256_v1 }
  0xc9   : > { %931 = vmatprep.mubr.msk.f32.mxu1 %vm1257_vm0, %v1258_v31 }
  0xcb   : > { %1035 = vmatpush3.bf16.msra.mxu1 %v1034_v51  ;;  %1074 = vmatpush3.bf16.msra.mxu0 %v1073_v52 }
  0xcc   : > { %1036 = vmatprep.subr.bf16.mxu1 %v1256_v1  ;;  %1075 = vmatprep.subr.bf16.mxu0 %v1256_v1 }
  0xcf   : > { %1038 = vmatpush3.bf16.msra.mxu1 %v1037_v60  ;;  %1077 = vmatpush3.bf16.msra.mxu0 %v1076_v61 }
  0xd0   : > { %1039 = vmatprep.subr.bf16.mxu1 %v1256_v1  ;;  %992 = vmatprep.subr.mxu0 %v1258_v31 }
  0xd3   : > { %1041 = vmatpush3.bf16.msra.mxu1 %v1040_v3  ;;  %993 = vmatpush3.msra.mxu0 %v323_v19 }
  0xd4   : > { %995 = vmatmul.mubr.msk.f32.vlgmr.msra.gmra.mrb[0].mxu0 %vm172_vm2, %v824_v11  ;;  %1078 = vmatprep.subr.bf16.mxu0 %v1256_v1 }
  0xd5   : > { %1080 = vmatpush3.bf16.msra.mxu0 %v1365_v16  ;;  %929 = vmatprep.subr.mxu1 %v1258_v31 }
  0xd6   : > { %1081 = vmatprep.subr.bf16.mxu0 %v1256_v1  ;;  %1015 = vmatprep.mubr.msk.f32.mxu0 %vm1257_vm0, %v1258_v31 }
  0xd7   : > { %930 = vmatpush3.msra.mxu1 %v325_v21 }
  0xd8   : > { %932 = vmatmul.mubr.msk.f32.vlgmr.msra.gmra.mrb[0].mxu1 %vm172_vm2, %v824_v11  ;;  %1042 = vmatprep.subr.bf16.mxu1 %v1256_v1 }
  0xd9   : > { %1044 = vmatpush3.bf16.msra.mxu1 %v1043_v4  ;;  %1083 = vmatpush3.bf16.msra.mxu0 %v1379_v23 }
  0xda   : > { %1045 = vmatprep.subr.bf16.mxu1 %v1256_v1  ;;  %1084 = vmatprep.subr.bf16.mxu0 %v1256_v1 }
  0xdb   : > { %952 = vmatprep.mubr.msk.f32.mxu1 %vm1257_vm0, %v1258_v31 }
  0xdd   : > { %1047 = vmatpush3.bf16.msra.mxu1 %v1046_v5  ;;  %1086 = vmatpush3.bf16.msra.mxu0 %v1401_v35 }
  0xde   : > { %1048 = vmatprep.subr.bf16.mxu1 %v1256_v1  ;;  %1087 = vmatprep.subr.bf16.mxu0 %v1256_v1 }
  0xe1   : > { %1050 = vmatpush3.bf16.msra.mxu1 %v1049_v6  ;;  %1089 = vmatpush3.bf16.msra.mxu0 %v1409_v44 }
  0xe2   : > { %1051 = vmatprep.subr.bf16.mxu1 %v1256_v1  ;;  %1013 = vmatprep.subr.mxu0 %v1258_v31 }
  0xe5   : > { %1053 = vmatpush3.bf16.msra.mxu1 %v1052_v7  ;;  %1014 = vmatpush3.msra.mxu0 %v1419_v55 }
  0xe6   : > { %1016 = vmatmul.mubr.msk.f32.vlgmr.msra.gmra.mrb[0].mxu0 %vm172_vm2, %v824_v11  ;;  %950 = vmatprep.subr.mxu1 %v1258_v31 }
  0xe9   : > { %951 = vmatpush3.msra.mxu1 %v322_v18 }
  0xea   : > { %953 = vmatmul.mubr.f32.vlgmr.msra.gmra.mrb[0].mxu1 %v255_v13 }
 0x1b9   : > { %v726_v16 = vpop.f32.mrb[0].mxu0 }
 0x1ba   : > { %v1017_v22 = vpop.f32.mrb[1].mxu0 }
 0x1bd   : > { %v466_v1 = vpop.f32.mrb[0].mxu1 }
 0x1be   : > { %v1090_v23 = vadd.f32 %v726_v16, %v466_v1  ;;  %v954_v24 = vpop.f32.mrb[1].mxu1 }
 0x1c0   : > { %730 = vst.msk [vmem:[%s149_s26] sm:$0xff] %vm172_vm2, %v1090_v23 }
 0x1c1   : > { %1197 = shalt.err (!%p1194_p7)
}
 0x1c2   : > { %s1198_s7 = scalar_lea.hbm %s1484_s30, 128  ;;  %s1202_s16 = scalar_lea.hbm %s1529_s2, 256 }
 0x1c3   : > { %p1199_p8 = scmp.ne.s32.totalorder %s1484_s30, %s1198_s7  ;;  %p1203_p1 = scmp.lt.u32.totalorder %s1484_s30, %s1529_s2 }
 0x1c4   : > { %p1204_p0 = scmp.lt.u32.totalorder %s1202_s16, %s1198_s7  ;;  %p1206_p6 = scmp.lt.u32.totalorder %s1198_s7, %s1484_s30 }
 0x1c5   : > { %p1200_p11 = pnand %p1199_p8, %p1540_p9 }
 0x1c6   : > { %p1205_p5 = por %p1204_p0, %p1203_p1 }
 0x1c7   : > { %p1201_p13 = pneg %p1200_p11 }
 0x1c8   : > { %p1207_p10 = por %p1206_p6, %p1205_p5 }
 0x1ca   : > { %p1208_p12 = pnand %p1207_p10, %p1201_p13 }
 0x1cc   : > { %1211 = shalt.err (!%p1208_p12)
}
 0x1cd   : > { %1103 = dma.vmem_to_hbm [thread:$0]  (%p1540_p9), %s1486_s27, 128, %s1484_s30, %s732_s3  }
 0x1ce PF: > { %p1115_p2 = scmp.ge.s32.totalorder %s1250_s12, 2  ;;  %s757_s22 = sand.u32 1, %s1238_s9  }
 0x1cf   : > { %p1541_p3 = scmp.ne.s32.totalorder %s1534_s20, 0  ;;  %s758_s23 = scalar_lea.sflag [#allocation4], %s757_s22 }
 0x1d1   : > { %p1110_p4 = pnand %p1115_p2, %p1541_p3 }
 0x1d3   : > { %1233 = dma.done.wait (!%p1110_p4), %s758_s23, 128  }
 0x1d4   : > { %1235 = vsyncadd (!%p1110_p4), %s758_s23, 4294967168  ;;  %p13_p7 = scmp.ge.s32.totalorder %s1300_s15, 4   ;;  %s1542_s9 = smov %s1242_s10 }
 0x1d5   : > { %s1543_s10 = smov %s1246_s11  ;;  %s1544_s11 = smov %s1311_s18 }
 0x1d6   : > { %s1545_s12 = smov %s1300_s15  ;;  %15 = sbr.rel (!%p13_p7) target bundleno = 4 (0x4), region = 68 }
 0x1dd   :  { %763 = vsyncpa [#allocation3], 1 }
 0x1de   :  { %765 = vsyncpa [#allocation3 + $0x1], 1 }
 0x1df   :  { %766 = vsyncpa [#allocation4], 1 }
 0x1e0   :  { %768 = vsyncpa [#allocation4 + $0x1], 1 }

</bundles_post_ra>
